<compile_context>
chip_gen: v6e
topology: v6e:2x2x1
jax: 0.10.0
libtpu: 0.0.40
codegen_flags: <defaults>
</compile_context>

<pallas_src>
import functools

import jax
import jax.numpy as jnp
from jax.experimental import pallas as pl
from jax.experimental.pallas import tpu as pltpu


def _round_up(x, m):
    return (x + m - 1) // m * m


def dan_kernel(x_ref, w1_ref, b1_ref, w2_ref, b2_ref, o_ref, acc_ref):
    # x_ref : (TB, TS, Dp) bf16/f32    w1_ref: (Dp, Hp) f32 (pre-scaled by 1/S)
    # b1_ref: (1, Hp)                  w2_ref: (Hp, Op)     b2_ref: (1, Op)
    # o_ref : (TB, Op) f32             acc_ref: (TB, Dp) f32 scratch
    s = pl.program_id(1)

    @pl.when(s == 0)
    def _():
        acc_ref[...] = jnp.zeros_like(acc_ref)

    # Sequence-sum for this tile; accumulate in f32 regardless of X's storage
    # dtype (only this tile is ever live in f32, not the whole X).
    acc_ref[...] += jnp.sum(x_ref[...], axis=1, dtype=jnp.float32)

    @pl.when(s == pl.num_programs(1) - 1)
    def _():
        xm = acc_ref[...]                 # sum(x); 1/S already folded into w1
        h = jnp.dot(xm, w1_ref[...], preferred_element_type=jnp.float32)
        h = jnp.maximum(h + b1_ref[...], 0.0)
        y = jnp.dot(h, w2_ref[...], preferred_element_type=jnp.float32)
        o_ref[...] = jax.nn.sigmoid(y + b2_ref[...]).astype(o_ref.dtype)


@functools.partial(jax.jit, static_argnames=("x_store_dtype",))
def dan_forward(x, w1, b1, w2, b2, *, x_store_dtype=jnp.bfloat16):
    """x: (B, S, D); w1: (D, H); b1: (H,); w2: (H, O); b2: (O,) -> (B, O) f32."""
    B, S, D = x.shape
    H = w1.shape[1]
    O = w2.shape[1]

    # Lane-dense feature dims (multiples of the 128-lane vreg width).
    Dp = _round_up(D, 128)
    Hp = _round_up(H, 128)
    Op = _round_up(O, 128)

    # Batch tile: fill the MXU M dimension for large B, stay minimal for tiny B.
    TB = min(256, _round_up(B, 8))
    Bp = _round_up(B, TB)

    # Seq tile: budget ~8 MiB per (double-buffered) X tile so the pipeline
    # fits comfortably inside v7x's 64 MiB VMEM (and v5e/v6e's 128 MiB).
    x_itemsize = jnp.dtype(x_store_dtype).itemsize
    budget = 8 * 1024 * 1024
    ts_cap = max(8, (budget // (TB * Dp * x_itemsize)) // 8 * 8)
    TS = min(ts_cap, _round_up(S, 8))
    Sp = _round_up(S, TS)

    # Zero-pad (padded seq rows / feature cols contribute nothing) and fold
    # the 1/S of the mean into w1 so the kernel only accumulates a sum.
    xp = jnp.pad(x, ((0, Bp - B), (0, Sp - S), (0, Dp - D))).astype(x_store_dtype)
    w1p = jnp.pad(w1.astype(jnp.float32) / S, ((0, Dp - D), (0, Hp - H)))
    b1p = jnp.pad(b1.astype(jnp.float32), (0, Hp - H)).reshape(1, Hp)
    w2p = jnp.pad(w2.astype(jnp.float32), ((0, Hp - H), (0, Op - O)))
    b2p = jnp.pad(b2.astype(jnp.float32), (0, Op - O)).reshape(1, Op)

    grid = (Bp // TB, Sp // TS)

    # Explicit VMEM ceiling: 2x double-buffered X tile + resident weights +
    # output tile + scratch + slack, clamped to a safe range for all chips.
    x_tile_bytes = TB * TS * Dp * x_itemsize
    w_bytes = (Dp * Hp + Hp * Op + Hp + Op) * 4
    vmem_limit = 2 * x_tile_bytes + 2 * w_bytes + 2 * TB * Op * 4 + TB * Dp * 4
    vmem_limit = int(max(32 << 20, min(vmem_limit + (4 << 20), 48 << 20)))

    out = pl.pallas_call(
        dan_kernel,
        out_shape=jax.ShapeDtypeStruct((Bp, Op), jnp.float32),
        grid=grid,
        in_specs=[
            pl.BlockSpec((TB, TS, Dp), lambda i, s: (i, s, 0)),
            pl.BlockSpec((Dp, Hp), lambda i, s: (0, 0)),   # resident weights
            pl.BlockSpec((1, Hp), lambda i, s: (0, 0)),
            pl.BlockSpec((Hp, Op), lambda i, s: (0, 0)),
            pl.BlockSpec((1, Op), lambda i, s: (0, 0)),
        ],
        out_specs=pl.BlockSpec((TB, Op), lambda i, s: (i, 0)),
        scratch_shapes=[pltpu.VMEM((TB, Dp), jnp.float32)],
        compiler_params=pltpu.CompilerParams(
            dimension_semantics=("parallel", "arbitrary"),
            vmem_limit_bytes=vmem_limit,
        ),
    )(xp, w1p, b1p, w2p, b2p)

    return out[:B, :O]


def dan_reference(x, w1, b1, w2, b2):
    xm = jnp.mean(x, axis=1)
    h = jnp.maximum(xm @ w1 + b1, 0.0)
    return jax.nn.sigmoid(h @ w2 + b2)


if __name__ == "__main__":
    # Small shapes consistent with the module's forward.
    B, S, D, H, O = 2, 8, 32, 32, 16

    key = jax.random.PRNGKey(0)
    kx, kw1, kb1, kw2, kb2 = jax.random.split(key, 5)

    x = jax.random.normal(kx, (B, S, D), dtype=jnp.float32)

    # Deterministic parameter init (PyTorch Linear-style uniform bounds).
    bound1 = 1.0 / jnp.sqrt(D)
    bound2 = 1.0 / jnp.sqrt(H)
    w1 = jax.random.uniform(kw1, (D, H), minval=-bound1, maxval=bound1,
                            dtype=jnp.float32)
    b1 = jax.random.uniform(kb1, (H,), minval=-bound1, maxval=bound1,
                            dtype=jnp.float32)
    w2 = jax.random.uniform(kw2, (H, O), minval=-bound2, maxval=bound2,
                            dtype=jnp.float32)
    b2 = jax.random.uniform(kb2, (O,), minval=-bound2, maxval=bound2,
                            dtype=jnp.float32)

    out = jax.block_until_ready(dan_forward(x, w1, b1, w2, b2))

    # Reference on the same bf16-rounded X the kernel reads from HBM.
    x_q = x.astype(jnp.bfloat16).astype(jnp.float32)
    ref = dan_reference(x_q, w1, b1, w2, b2)

    assert out.shape == (B, O)
    assert jnp.allclose(out, ref, atol=2e-5, rtol=2e-5), "mismatch vs reference"

    print("KERNEL_OK")
</pallas_src>

<mosaic_0001>
module attributes {stable_mosaic.version = 11 : i64} {
  func.func @dan_kernel(%arg0: i32, %arg1: i32, %arg2: memref<8x8x128xbf16, #tpu.memory_space<vmem>>, %arg3: memref<128x128xf32, #tpu.memory_space<vmem>>, %arg4: memref<1x128xf32, #tpu.memory_space<vmem>>, %arg5: memref<128x128xf32, #tpu.memory_space<vmem>>, %arg6: memref<1x128xf32, #tpu.memory_space<vmem>>, %arg7: memref<8x128xf32, #tpu.memory_space<vmem>>, %arg8: memref<8x128xf32, #tpu.memory_space<vmem>>) attributes {dimension_semantics = [#tpu.dimension_semantics<parallel>, #tpu.dimension_semantics<arbitrary>], iteration_bounds = array<i64: 1, 1>, scalar_prefetch = 0 : i64, scratch_operands = 1 : i64, tpu.core_type = #tpu.core_type<tc>, window_params = [{transform_indices = @transform_0, window_bounds = array<i64: 8, 8, 128>}, {pipeline_mode = #tpu.pipeline_mode<synchronous>, transform_indices = @transform_1, window_bounds = array<i64: 128, 128>}, {pipeline_mode = #tpu.pipeline_mode<synchronous>, transform_indices = @transform_2, window_bounds = array<i64: 1, 128>}, {pipeline_mode = #tpu.pipeline_mode<synchronous>, transform_indices = @transform_3, window_bounds = array<i64: 128, 128>}, {pipeline_mode = #tpu.pipeline_mode<synchronous>, transform_indices = @transform_4, window_bounds = array<i64: 1, 128>}, {transform_indices = @transform_5, window_bounds = array<i64: 8, 128>}]} {
    %c0_i32 = arith.constant 0 : i32
    %0 = arith.cmpi eq, %arg1, %c0_i32 : i32
    %1 = arith.extui %0 : i1 to i32
    %c0_i32_0 = arith.constant 0 : i32
    %2 = arith.cmpi ne, %1, %c0_i32_0 : i32
    scf.if %2 {
      %cst_9 = arith.constant 0.000000e+00 : f32
      %12 = vector.broadcast %cst_9 : f32 to vector<8x128xf32>
      %c0_10 = arith.constant 0 : index
      %c0_11 = arith.constant 0 : index
      %13 = vector.load %arg8[%c0_10, %c0_11] : memref<8x128xf32, #tpu.memory_space<vmem>>, vector<8x128xf32>
      tpu.vector_store %arg8[%c0_10, %c0_11], %12 {strides = array<i32>} : memref<8x128xf32, #tpu.memory_space<vmem>>, vector<8x128xf32>,
    } else {
    }
    %c0 = arith.constant 0 : index
    %c0_1 = arith.constant 0 : index
    %3 = vector.load %arg8[%c0, %c0_1] : memref<8x128xf32, #tpu.memory_space<vmem>>, vector<8x128xf32>
    %c0_2 = arith.constant 0 : index
    %c0_3 = arith.constant 0 : index
    %c0_4 = arith.constant 0 : index
    %4 = vector.load %arg2[%c0_2, %c0_3, %c0_4] : memref<8x8x128xbf16, #tpu.memory_space<vmem>>, vector<8x8x128xbf16>
    %5 = arith.extf %4 : vector<8x8x128xbf16> to vector<8x8x128xf32>
    %cst = arith.constant dense<0.000000e+00> : vector<8x128xf32>
    %6 = vector.multi_reduction <add>, %5, %cst [1] : vector<8x8x128xf32> to vector<8x128xf32>
    %7 = arith.addf %3, %6 : vector<8x128xf32>
    %c0_5 = arith.constant 0 : index
    %c0_6 = arith.constant 0 : index
    %8 = vector.load %arg8[%c0_5, %c0_6] : memref<8x128xf32, #tpu.memory_space<vmem>>, vector<8x128xf32>
    tpu.vector_store %arg8[%c0_5, %c0_6], %7 {strides = array<i32>} : memref<8x128xf32, #tpu.memory_space<vmem>>, vector<8x128xf32>,
    %c0_i32_7 = arith.constant 0 : i32
    %9 = arith.cmpi eq, %arg1, %c0_i32_7 : i32
    %10 = arith.extui %9 : i1 to i32
    %c0_i32_8 = arith.constant 0 : i32
    %11 = arith.cmpi ne, %10, %c0_i32_8 : i32
    scf.if %11 {
      %c0_9 = arith.constant 0 : index
      %c0_10 = arith.constant 0 : index
      %12 = vector.load %arg8[%c0_9, %c0_10] : memref<8x128xf32, #tpu.memory_space<vmem>>, vector<8x128xf32>
      %c0_11 = arith.constant 0 : index
      %c0_12 = arith.constant 0 : index
      %13 = vector.load %arg3[%c0_11, %c0_12] : memref<128x128xf32, #tpu.memory_space<vmem>>, vector<128x128xf32>
      %cst_13 = arith.constant dense<0.000000e+00> : vector<8x128xf32>
      %14 = tpu.matmul %12, %13, %cst_13 {dimension_numbers = #tpu.dot_dimension_numbers<[1], [0], [0], [1], [0, 0, 1, 1], [], []>} : vector<8x128xf32>, vector<128x128xf32>, vector<8x128xf32> -> vector<8x128xf32>
      %c0_14 = arith.constant 0 : index
      %c0_15 = arith.constant 0 : index
      %15 = vector.load %arg4[%c0_14, %c0_15] : memref<1x128xf32, #tpu.memory_space<vmem>>, vector<1x128xf32>
      %16 = vector.broadcast %15 : vector<1x128xf32> to vector<8x128xf32>
      %17 = arith.addf %14, %16 : vector<8x128xf32>
      %cst_16 = arith.constant 0.000000e+00 : f32
      %18 = vector.broadcast %cst_16 : f32 to vector<8x128xf32>
      %19 = arith.maximumf %17, %18 : vector<8x128xf32>
      %c0_17 = arith.constant 0 : index
      %c0_18 = arith.constant 0 : index
      %20 = vector.load %arg5[%c0_17, %c0_18] : memref<128x128xf32, #tpu.memory_space<vmem>>, vector<128x128xf32>
      %cst_19 = arith.constant dense<0.000000e+00> : vector<8x128xf32>
      %21 = tpu.matmul %19, %20, %cst_19 {dimension_numbers = #tpu.dot_dimension_numbers<[1], [0], [0], [1], [0, 0, 1, 1], [], []>} : vector<8x128xf32>, vector<128x128xf32>, vector<8x128xf32> -> vector<8x128xf32>
      %c0_20 = arith.constant 0 : index
      %c0_21 = arith.constant 0 : index
      %22 = vector.load %arg6[%c0_20, %c0_21] : memref<1x128xf32, #tpu.memory_space<vmem>>, vector<1x128xf32>
      %23 = vector.broadcast %22 : vector<1x128xf32> to vector<8x128xf32>
      %24 = arith.addf %21, %23 : vector<8x128xf32>
      %25 = arith.negf %24 : vector<8x128xf32>
      %26 = math.exp %25 : vector<8x128xf32>
      %cst_22 = arith.constant 1.000000e+00 : f32
      %27 = vector.broadcast %cst_22 : f32 to vector<8x128xf32>
      %28 = arith.addf %27, %26 : vector<8x128xf32>
      %29 = arith.divf %27, %28 : vector<8x128xf32>
      %c0_23 = arith.constant 0 : index
      %c0_24 = arith.constant 0 : index
      %30 = vector.load %arg7[%c0_23, %c0_24] : memref<8x128xf32, #tpu.memory_space<vmem>>, vector<8x128xf32>
      tpu.vector_store %arg7[%c0_23, %c0_24], %29 {strides = array<i32>} : memref<8x128xf32, #tpu.memory_space<vmem>>, vector<8x128xf32>,
    } else {
    }
    return
  }
  func.func @transform_0(%arg0: i32, %arg1: i32) -> (i32, i32, i32) {
    %c0_i32 = arith.constant 0 : i32
    %c0_i32_0 = arith.constant 0 : i32
    return %arg0, %arg1, %c0_i32 : i32, i32, i32
  }
  func.func @transform_1(%arg0: i32, %arg1: i32) -> (i32, i32) {
    %c0_i32 = arith.constant 0 : i32
    %c0_i32_0 = arith.constant 0 : i32
    %c0_i32_1 = arith.constant 0 : i32
    return %c0_i32, %c0_i32_0 : i32, i32
  }
  func.func @transform_2(%arg0: i32, %arg1: i32) -> (i32, i32) {
    %c0_i32 = arith.constant 0 : i32
    %c0_i32_0 = arith.constant 0 : i32
    %c0_i32_1 = arith.constant 0 : i32
    return %c0_i32, %c0_i32_0 : i32, i32
  }
  func.func @transform_3(%arg0: i32, %arg1: i32) -> (i32, i32) {
    %c0_i32 = arith.constant 0 : i32
    %c0_i32_0 = arith.constant 0 : i32
    %c0_i32_1 = arith.constant 0 : i32
    return %c0_i32, %c0_i32_0 : i32, i32
  }
  func.func @transform_4(%arg0: i32, %arg1: i32) -> (i32, i32) {
    %c0_i32 = arith.constant 0 : i32
    %c0_i32_0 = arith.constant 0 : i32
    %c0_i32_1 = arith.constant 0 : i32
    return %c0_i32, %c0_i32_0 : i32, i32
  }
  func.func @transform_5(%arg0: i32, %arg1: i32) -> (i32, i32) {
    %c0_i32 = arith.constant 0 : i32
    %c0_i32_0 = arith.constant 0 : i32
    return %arg0, %c0_i32 : i32, i32
  }
}

</mosaic_0001>

<bundles_post_ra>
// kernel: dan_forward.1
= control target key start
LH: loop header
LB: loop body
LE: loop exit
PB: predicated region body
PF: predicated region fallthrough
CT: control target
= control target key end

     0   :  { %v449_v0 = vmov 0.0   ;;  %vm450_vm0 = vmmov 0   ;;  %vm98_vm1 = vcmask 1041409   ;;  %vm100_vm2 = vcmask 1042434   ;;  %s635_s1 = inlined_call_operand.vmem [shape: f32[128,128], index: 1, kind: input, shape index: {}]   ;;  %s636_s0 = inlined_call_operand.vmem [shape: bf16[8,8,128], index: 0, kind: input, shape index: {}]   ;;  %s637_s3 = inlined_call_operand.vmem [shape: f32[128,128], index: 3, kind: input, shape index: {}]   ;;  %s638_s2 = inlined_call_operand.vmem [shape: f32[1,128], index: 2, kind: input, shape index: {}]   ;;  %s639_s4 = inlined_call_operand.vmem [shape: f32[1,128], index: 4, kind: input, shape index: {}]   ;;  %s640_s5 = inlined_call_operand.vmem [shape: f32[8,128], index: 5, kind: output, shape index: {}]  }
   0x1   :  { %373 = vmatprep.subr.mxu0 %v449_v0  ;;  %v134_v1 = vld [vmem:[%s635_s1 + $0x78] sm:$0xff]  ;;  %v133_v2 = vld [vmem:[%s635_s1 + $0x70] sm:$0xff]  ;;  %405 = vmatprep.mubr.msk.f32.mxu0 %vm450_vm0, %v449_v0  ;;  %v132_v3 = vld [vmem:[%s635_s1 + $0x68] sm:$0xff]  ;;  %vm102_vm3 = vcmask 1043459   ;;  %vm104_vm4 = vcmask 1044484   ;;  %vm106_vm5 = vcmask 1045509  }
   0x2   :  { %374 = vmatpush3.msra.mxu0 %v134_v1  ;;  %408 = vmatprep.subr.mxu1 %v449_v0  ;;  %v131_v4 = vld [vmem:[%s635_s1 + $0x60] sm:$0xff]  ;;  %v130_v5 = vld [vmem:[%s635_s1 + $0x58] sm:$0xff]  ;;  %v336_v7 = vld [vmem:[%s636_s0 + $0x8] sm:$0xff]   ;;  %vm108_vm6 = vcmask 1046534   ;;  %vm110_vm7 = vcmask 1047559  }
   0x3   :  { %375 = vmatprep.subr.mxu0 %v449_v0  ;;  %440 = vmatprep.mubr.msk.f32.mxu1 %vm450_vm0, %v449_v0  ;;  %v321_v6 = vld [vmem:[%s636_s0] sm:$0xff]   ;;  %v326_v10 = vunpack.c.l.bf16 %v336_v7  ;;  %v327_v11 = vunpack.c.h.bf16 %v336_v7  ;;  %v337_v12 = vld [vmem:[%s636_s0 + $0x10] sm:$0xff]   ;;  %v338_v13 = vld [vmem:[%s636_s0 + $0x18] sm:$0xff]  }
   0x4   :  { %376 = vmatpush3.msra.mxu0 %v133_v2  ;;  %v322_v8 = vunpack.c.l.bf16 %v321_v6  ;;  %v323_v9 = vunpack.c.h.bf16 %v321_v6  ;;  %v228_v14 = vld [vmem:[%s637_s3 + $0x78] sm:$0xff]  ;;  %v330_v15 = vunpack.c.l.bf16 %v337_v12  ;;  %v331_v16 = vunpack.c.h.bf16 %v337_v12  ;;  %v227_v19 = vld [vmem:[%s637_s3 + $0x70] sm:$0xff]  ;;  %v128_v29 = vld [vmem:[%s635_s1 + $0x48] sm:$0xff] }
   0x5   :  { %377 = vmatprep.subr.mxu0 %v449_v0  ;;  %v334_v17 = vunpack.c.l.bf16 %v338_v13  ;;  %v335_v18 = vunpack.c.h.bf16 %v338_v13  ;;  %409 = vmatpush3.msra.mxu1 %v228_v14  ;;  %v129_v20 = vld [vmem:[%s635_s1 + $0x50] sm:$0xff]  ;;  %v54_v23 = vrot.slane %v326_v10, 4  ;;  %v60_v24 = vrot.slane %v327_v11, 4  ;;  %v226_v34 = vld [vmem:[%s637_s3 + $0x68] sm:$0xff]  ;;  %v127_v39 = vld [vmem:[%s635_s1 + $0x40] sm:$0xff] }
   0x6   :  { %378 = vmatpush3.msra.mxu0 %v132_v3  ;;  %v42_v21 = vrot.slane %v322_v8, 4  ;;  %v48_v22 = vrot.slane %v323_v9, 4  ;;  %410 = vmatprep.subr.mxu1 %v449_v0  ;;  %v66_v25 = vrot.slane %v330_v15, 4  ;;  %v72_v26 = vrot.slane %v331_v16, 4  ;;  %v126_v48 = vld [vmem:[%s635_s1 + $0x38] sm:$0xff]  ;;  %v225_v53 = vld [vmem:[%s637_s3 + $0x60] sm:$0xff] }
   0x7   :  { %379 = vmatprep.subr.mxu0 %v449_v0  ;;  %v78_v27 = vrot.slane %v334_v17, 4  ;;  %v84_v28 = vrot.slane %v335_v18, 4  ;;  %411 = vmatpush3.msra.mxu1 %v227_v19  ;;  %v55_v32 = vadd.f32 %v326_v10, %v54_v23  ;;  %v61_v33 = vadd.f32 %v327_v11, %v60_v24  ;;  %v125_v57 = vld [vmem:[%s635_s1 + $0x30] sm:$0xff]  ;;  %v124_v3 = vld [vmem:[%s635_s1 + $0x28] sm:$0xff]  ;;  %v123_v10 = vld [vmem:[%s635_s1 + $0x20] sm:$0xff] }
   0x8   :  { %380 = vmatpush3.msra.mxu0 %v131_v4  ;;  %v43_v30 = vadd.f32 %v322_v8, %v42_v21  ;;  %v49_v31 = vadd.f32 %v323_v9, %v48_v22  ;;  %v67_v35 = vadd.f32 %v330_v15, %v66_v25  ;;  %v73_v36 = vadd.f32 %v331_v16, %v72_v26  ;;  %v224_v8 = vld [vmem:[%s637_s3 + $0x58] sm:$0xff]  ;;  %v223_v13 = vld [vmem:[%s637_s3 + $0x50] sm:$0xff]  ;;  %v222_v19 = vld [vmem:[%s637_s3 + $0x48] sm:$0xff] }
   0x9   :  { %381 = vmatprep.subr.mxu0 %v449_v0  ;;  %v79_v37 = vadd.f32 %v334_v17, %v78_v27  ;;  %v85_v38 = vadd.f32 %v335_v18, %v84_v28  ;;  %v56_v42 = vrot.slane %v55_v32, 2  ;;  %v62_v43 = vrot.slane %v61_v33, 2  ;;  %412 = vmatprep.subr.mxu1 %v449_v0  ;;  %v122_v16 = vld [vmem:[%s635_s1 + $0x18] sm:$0xff]  ;;  %v121_v21 = vld [vmem:[%s635_s1 + $0x10] sm:$0xff]  ;;  %v221_v23 = vld [vmem:[%s637_s3 + $0x40] sm:$0xff] }
   0xa   :  { %382 = vmatpush3.msra.mxu0 %v130_v5  ;;  %v44_v40 = vrot.slane %v43_v30, 2  ;;  %v50_v41 = vrot.slane %v49_v31, 2  ;;  %v68_v44 = vrot.slane %v67_v35, 2  ;;  %v74_v45 = vrot.slane %v73_v36, 2  ;;  %413 = vmatpush3.msra.mxu1 %v226_v34  ;;  %v120_v25 = vld [vmem:[%s635_s1 + $0x8] sm:$0xff]  ;;  %v220_v27 = vld [vmem:[%s637_s3 + $0x38] sm:$0xff] }
   0xb   :  { %383 = vmatprep.subr.mxu0 %v449_v0  ;;  %v80_v46 = vrot.slane %v79_v37, 2  ;;  %v86_v47 = vrot.slane %v85_v38, 2  ;;  %v57_v51 = vadd.f32 %v56_v42, %v55_v32  ;;  %v63_v52 = vadd.f32 %v62_v43, %v61_v33  ;;  %414 = vmatprep.subr.mxu1 %v449_v0  ;;  %v119_v28 = vld [vmem:[%s635_s1] sm:$0xff]  ;;  %v216_v33 = vld [vmem:[%s637_s3 + $0x18] sm:$0xff]  ;;  %v215_v34 = vld [vmem:[%s637_s3 + $0x10] sm:$0xff] }
   0xc   :  { %384 = vmatpush3.msra.mxu0 %v129_v20  ;;  %v45_v49 = vadd.f32 %v44_v40, %v43_v30  ;;  %v51_v50 = vadd.f32 %v50_v41, %v49_v31  ;;  %v69_v54 = vadd.f32 %v68_v44, %v67_v35  ;;  %v75_v55 = vadd.f32 %v74_v45, %v73_v36  ;;  %v218_v31 = vld [vmem:[%s637_s3 + $0x28] sm:$0xff]  ;;  %v217_v32 = vld [vmem:[%s637_s3 + $0x20] sm:$0xff] }
   0xd   :  { %385 = vmatprep.subr.mxu0 %v449_v0  ;;  %v81_v56 = vadd.f32 %v80_v46, %v79_v37  ;;  %v58_v60 = vrot.slane %v57_v51, 1  ;;  %v64_v61 = vrot.slane %v63_v52, 1  ;;  %v87_v2 = vadd.f32 %v86_v47, %v85_v38  ;;  %415 = vmatpush3.msra.mxu1 %v225_v53  ;;  %v214_v35 = vld [vmem:[%s637_s3 + $0x8] sm:$0xff]  ;;  %v213_v36 = vld [vmem:[%s637_s3] sm:$0xff] }
   0xe   :  { %386 = vmatpush3.msra.mxu0 %v128_v29  ;;  %v46_v58 = vrot.slane %v45_v49, 1  ;;  %v52_v59 = vrot.slane %v51_v50, 1  ;;  %v70_v62 = vrot.slane %v69_v54, 1  ;;  %v76_v63 = vrot.slane %v75_v55, 1  ;;  %416 = vmatprep.subr.mxu1 %v449_v0  ;;  %v219_v29 = vld [vmem:[%s637_s3 + $0x30] sm:$0xff] }
   0xf   :  { %387 = vmatprep.subr.mxu0 %v449_v0  ;;  %v82_v1 = vrot.slane %v81_v56, 1  ;;  %v59_v6 = vadd.f32 %v58_v60, %v57_v51  ;;  %v65_v7 = vadd.f32 %v64_v61, %v63_v52  ;;  %v88_v14 = vrot.slane %v87_v2, 1  ;;  %417 = vmatpush3.msra.mxu1 %v224_v8  ;;  %v317_v37 = vld [vmem:[%s638_s2] ss:$0 sm:$0xff] }
  0x10   :  { %388 = vmatpush3.msra.mxu0 %v127_v39  ;;  %v47_v4 = vadd.f32 %v46_v58, %v45_v49  ;;  %v53_v5 = vadd.f32 %v52_v59, %v51_v50  ;;  %v71_v9 = vadd.f32 %v70_v62, %v69_v54  ;;  %v77_v11 = vadd.f32 %v76_v63, %v75_v55  ;;  %v318_v42 = vld [vmem:[%s639_s4] ss:$0 sm:$0xff] }
  0x11   :  { %389 = vmatprep.subr.mxu0 %v449_v0  ;;  %v83_v17 = vadd.f32 %v82_v1, %v81_v56  ;;  %418 = vmatprep.subr.mxu1 %v449_v0  ;;  %v89_v24 = vadd.f32 %v88_v14, %v87_v2 }
  0x12   :  { %390 = vmatpush3.msra.mxu0 %v126_v48  ;;  %v99_v12 = vsel %vm98_vm1, %v53_v5, %v47_v4  ;;  %419 = vmatpush3.msra.mxu1 %v223_v13 }
  0x13   :  { %391 = vmatprep.subr.mxu0 %v449_v0  ;;  %v101_v15 = vsel %vm100_vm2, %v59_v6, %v99_v12  ;;  %420 = vmatprep.subr.mxu1 %v449_v0 }
  0x14   :  { %392 = vmatpush3.msra.mxu0 %v125_v57  ;;  %v103_v18 = vsel %vm102_vm3, %v65_v7, %v101_v15  ;;  %421 = vmatpush3.msra.mxu1 %v222_v19 }
  0x15   :  { %393 = vmatprep.subr.mxu0 %v449_v0  ;;  %v105_v20 = vsel %vm104_vm4, %v71_v9, %v103_v18  ;;  %422 = vmatprep.subr.mxu1 %v449_v0 }
  0x16   :  { %394 = vmatpush3.msra.mxu0 %v124_v3  ;;  %v107_v22 = vsel %vm106_vm5, %v77_v11, %v105_v20  ;;  %423 = vmatpush3.msra.mxu1 %v221_v23 }
  0x17   :  { %395 = vmatprep.subr.mxu0 %v449_v0  ;;  %v109_v26 = vsel %vm108_vm6, %v83_v17, %v107_v22  ;;  %424 = vmatprep.subr.mxu1 %v449_v0 }
  0x18   :  { %396 = vmatpush3.msra.mxu0 %v123_v10  ;;  %v111_v30 = vsel %vm110_vm7, %v89_v24, %v109_v26  ;;  %425 = vmatpush3.msra.mxu1 %v220_v27 }
  0x19   :  { %397 = vmatprep.subr.mxu0 %v449_v0  ;;  %426 = vmatprep.subr.mxu1 %v449_v0 }
  0x1a   :  { %398 = vmatpush3.msra.mxu0 %v122_v16  ;;  %427 = vmatpush3.msra.mxu1 %v219_v29 }
  0x1b   :  { %399 = vmatprep.subr.mxu0 %v449_v0  ;;  %428 = vmatprep.subr.mxu1 %v449_v0 }
  0x1c   :  { %400 = vmatpush3.msra.mxu0 %v121_v21  ;;  %429 = vmatpush3.msra.mxu1 %v218_v31 }
  0x1d   :  { %401 = vmatprep.subr.mxu0 %v449_v0  ;;  %430 = vmatprep.subr.mxu1 %v449_v0 }
  0x1e   :  { %402 = vmatpush3.msra.mxu0 %v120_v25  ;;  %431 = vmatpush3.msra.mxu1 %v217_v32 }
  0x1f   :  { %403 = vmatprep.subr.mxu0 %v449_v0  ;;  %432 = vmatprep.subr.mxu1 %v449_v0 }
  0x20   :  { %404 = vmatpush3.msra.mxu0 %v119_v28  ;;  %433 = vmatpush3.msra.mxu1 %v216_v33 }
  0x21   :  { %406 = vmatmul.mubr.f32.vlgmr.msra.gmra.mxu0 %v111_v30  ;;  %434 = vmatprep.subr.mxu1 %v449_v0 }
  0x22   :  { %435 = vmatpush3.msra.mxu1 %v215_v34 }
  0x23   :  { %436 = vmatprep.subr.mxu1 %v449_v0 }
  0x24   :  { %437 = vmatpush3.msra.mxu1 %v214_v35 }
  0x25   :  { %438 = vmatprep.subr.mxu1 %v449_v0 }
  0x26   :  { %439 = vmatpush3.msra.mxu1 %v213_v36 }
  0xe1   :  { %v208_v38 = vpop.f32.mrf.mxu0 }
  0xe2   :  { %v209_v39 = vadd.f32 %v317_v37, %v208_v38 }
  0xe3   :  { %v407_v40 = vpop.f32.mrf.mxu0 }
  0xe4   :  { %v212_v41 = vmax.f32 %v209_v39, 0.0 }
  0xe6   :  { %441 = vmatmul.mubr.f32.vlgmr.msra.gmra.mxu1 %v212_v41 }
 0x1a6   :  { %v302_v43 = vpop.f32.mrf.mxu1 }
 0x1a7   :  { %v303_v0 = vadd.f32 %v318_v42, %v302_v43 }
 0x1a8   :  { %v442_v44 = vpop.f32.mrf.mxu1 }
 0x1a9   :  { %v319_v45 = vmul.f32 -1.442695, %v303_v0 }
 0x1ab   :  { %445 = vpow2.f32 %v319_v45 }
 0x1b8   :  { %v446_v46 = vpop.eup %445 }
 0x1b9   :  { %v309_v47 = vadd.f32 1.0, %v446_v46 }
 0x1bb   :  { %447 = vrcp.f32 %v309_v47 }
 0x1c8   :  { %v448_v48 = vpop.eup %447 }
 0x1c9   :  { %312 = vst [vmem:[%s640_s5] sm:$0xff] %v448_v48 }

</bundles_post_ra>
